<compile_context>
chip_gen: v6e
topology: v6e:2x2x1
jax: 0.10.0
libtpu: 0.0.40
codegen_flags: <defaults>
</compile_context>

<pallas_src>
import functools

import jax
import jax.numpy as jnp
from jax.experimental import pallas as pl
from jax.experimental.pallas import tpu as pltpu


def _round_up(x, m):
    return (x + m - 1) // m * m


# ----------------------------- Pallas kernel --------------------------------
def _downsample_kernel(xe_ref, xo_ref, w_ref, b_ref, o_ref, *, th, wo):
    """One (batch, row-tile) grid step.

    xe_ref : (1, th+1, Wc, 2*Cin)  even padded rows, column pairs packed on C
    xo_ref : (1, th,   Wc, 2*Cin)  odd padded rows
    w_ref  : (6, 2*Cin, Np)        per kh: [cols(0,1) packed, col 2 (+zeros)]
    b_ref  : (1, Np)               f32 bias
    o_ref  : (1, th*wo, Np)        f32 output rows (flattened (th, wo))
    """
    c2 = xe_ref.shape[-1]
    m = th * wo

    def tap(src, dh, dw, k):
        # Contiguous (up to the dw=1 sublane shift) slice of the VMEM block,
        # layout-preserving flatten (wo % 8 == 0), bf16 MXU matmul, f32 result.
        lhs = src[0, dh:dh + th, dw:dw + wo, :].reshape(m, c2)
        return jnp.dot(lhs, w_ref[k], preferred_element_type=jnp.float32)

    # kh = 0 : even-row plane, rows [0, th)
    acc = b_ref[...] + tap(xe_ref, 0, 0, 0) + tap(xe_ref, 0, 1, 1)
    # kh = 1 : odd-row plane, rows [0, th)
    acc = acc + tap(xo_ref, 0, 0, 2) + tap(xo_ref, 0, 1, 3)
    # kh = 2 : even-row plane, rows [1, th+1)
    acc = acc + tap(xe_ref, 1, 0, 4) + tap(xe_ref, 1, 1, 5)
    # Single dense store of the f32 accumulator (no scratch, no RMW).
    o_ref[0] = acc


# ------------------------------ DownSample ----------------------------------
def downsample_init(key, in_ch, dtype=jnp.float32):
    """Matches the PyTorch module: xavier_uniform_ on weight (out,in,3,3),
    zeros on bias."""
    fan_in = in_ch * 3 * 3
    fan_out = in_ch * 3 * 3
    bound = (6.0 / (fan_in + fan_out)) ** 0.5
    weight = jax.random.uniform(
        key, (in_ch, in_ch, 3, 3), dtype=dtype, minval=-bound, maxval=bound)
    bias = jnp.zeros((in_ch,), dtype=dtype)
    return weight, bias


def downsample_forward_nhwc(x, weight, bias, *, compute_dtype=jnp.bfloat16,
                            row_tiles=None):
    """Conv2d(C, C, 3, stride=2, padding=1) on an NHWC input.

    Returns (B, Ho, Wo, C) in x.dtype.  `row_tiles` (optional) forces the
    number of output-row tiles (otherwise sized from the VMEM budget).
    """
    B, H, W, C = x.shape
    out_dtype = x.dtype
    Ho = (H - 1) // 2 + 1
    Wo = (W - 1) // 2 + 1
    Wo_p = _round_up(Wo, 8)          # sublane-dense output rows / aligned slices
    Np = _round_up(C, 128)           # lane-dense output channels
    Wc = Wo_p + 1                    # packed-plane width
    C2 = 2 * C                       # column-pair-packed channels
    in_item = jnp.dtype(compute_dtype).itemsize

    # --- VMEM budget -> row-tile height (v7x: 64 MiB, v5e/v6e: 128 MiB) -----
    try:
        vmem_cap = int(pltpu.get_tpu_info().vmem_capacity_bytes)
    except Exception:  # no TPU info available: assume the smallest (v7x) VMEM
        vmem_cap = 64 * 1024 * 1024

    w_bytes = 2 * (6 * C2 * Np * in_item + Np * 4)       # weights+bias, dbl-buf

    def step_bytes(t):
        xe_b = (t + 1) * Wc * C2 * in_item
        xo_b = t * Wc * C2 * in_item
        out_b = t * Wo_p * Np * 4
        # double-buffered pipelined blocks + ~2 f32 temporaries for the acc
        return 2 * (xe_b + xo_b + out_b) + 2 * t * Wo_p * Np * 4

    if row_tiles is None:
        budget = max(int(0.7 * vmem_cap) - w_bytes, 1 << 20)
        n_t, th = 1, Ho
        while th > 1 and step_bytes(th) > budget:
            n_t += 1
            th = -(-Ho // n_t)
    else:
        n_t = max(1, min(int(row_tiles), Ho))
        th = -(-Ho // n_t)
    Ho_p = n_t * th
    m = th * Wo_p

    # --- pad + row-parity split + column space-to-depth (one fused pass) ----
    pad_h = 2 * Ho_p + 1 - H
    pad_w = 2 * Wo_p + 1 - W
    Hp = 2 * Ho_p + 2
    xb = x.astype(compute_dtype)
    xp = jnp.pad(xb, ((0, 0), (1, pad_h), (1, pad_w), (0, 0)))
    xpc = xp.reshape(B, Hp, Wc, C2)          # free reshape: pack column pairs
    xe = xpc[:, 0::2]                        # (B, Ho_p + 1, Wc, C2) even rows
    xo = xpc[:, 1::2][:, :Ho_p]              # (B, Ho_p,     Wc, C2) odd rows

    # Row tiles; the 1-row halo of the even-row plane is duplicated only when
    # more than one tile is actually needed.
    if n_t == 1:
        xe_t = xe                                             # (B, th+1, Wc, C2)
        xo_t = xo                                             # (B, th,   Wc, C2)
    else:
        xe_t = jnp.stack([xe[:, t * th: t * th + th + 1] for t in range(n_t)],
                         axis=1).reshape(B * n_t, th + 1, Wc, C2)
        xo_t = xo.reshape(B * n_t, th, Wc, C2)

    # --- weights: (O, I, 3, 3) -> 6 packed (2C, Np) matrices, bias -> (1, Np)
    wt = jnp.transpose(weight, (2, 3, 1, 0))                  # (3, 3, Cin, Cout)
    wt = jnp.pad(wt, ((0, 0), (0, 0), (0, 0), (0, Np - C)))   # lane-pad Cout
    w01 = jnp.concatenate([wt[:, 0], wt[:, 1]], axis=1)       # (3, 2C, Np)
    w2 = jnp.concatenate([wt[:, 2], jnp.zeros_like(wt[:, 2])], axis=1)
    w6 = jnp.concatenate([w01[:, None], w2[:, None]], axis=1)  # (3, 2, 2C, Np)
    w6 = w6.reshape(6, C2, Np).astype(compute_dtype)
    b_row = jnp.pad(bias, (0, Np - C)).astype(jnp.float32).reshape(1, Np)

    kernel = functools.partial(_downsample_kernel, th=th, wo=Wo_p)
    need = step_bytes(th) + w_bytes
    vmem_limit = int(min(vmem_cap - (2 << 20),
                         max(32 << 20, int(1.5 * need) + (4 << 20))))

    out = pl.pallas_call(
        kernel,
        out_shape=jax.ShapeDtypeStruct((B, Ho_p * Wo_p, Np), jnp.float32),
        grid_spec=pltpu.PrefetchScalarGridSpec(
            num_scalar_prefetch=0,
            grid=(B, n_t),
            in_specs=[
                pl.BlockSpec((1, th + 1, Wc, C2),
                             lambda b, t: (b * n_t + t, 0, 0, 0)),
                pl.BlockSpec((1, th, Wc, C2),
                             lambda b, t: (b * n_t + t, 0, 0, 0)),
                pl.BlockSpec((6, C2, Np), lambda b, t: (0, 0, 0)),
                pl.BlockSpec((1, Np), lambda b, t: (0, 0)),
            ],
            out_specs=pl.BlockSpec((1, m, Np), lambda b, t: (b, t, 0)),
        ),
        compiler_params=pltpu.CompilerParams(
            dimension_semantics=("parallel", "parallel"),
            vmem_limit_bytes=vmem_limit,
        ),
    )(xe_t, xo_t, w6, b_row)

    y = out.reshape(B, Ho_p, Wo_p, Np)[:, :Ho, :Wo, :C]
    return y.astype(out_dtype)


@jax.jit
def downsample_forward(x_nchw, weight, bias, temb=None):
    """PyTorch-equivalent forward: Conv2d(C, C, 3, stride=2, padding=1);
    temb is ignored exactly as in the reference module (NCHW in / NCHW out).

    If the surrounding model is NHWC, call downsample_forward_nhwc directly
    and skip both layout transposes (this op is HBM-bound end to end).
    """
    del temb
    x = jnp.transpose(x_nchw, (0, 2, 3, 1))
    y = downsample_forward_nhwc(x, weight, bias)
    return jnp.transpose(y, (0, 3, 1, 2))


# ------------------------------- reference ----------------------------------
def _reference_conv(x_nchw, weight, bias):
    out = jax.lax.conv_general_dilated(
        x_nchw, weight,
        window_strides=(2, 2),
        padding=((1, 1), (1, 1)),
        dimension_numbers=("NCHW", "OIHW", "NCHW"),
        precision=jax.lax.Precision.HIGHEST,
    )
    return out + bias.reshape(1, -1, 1, 1)


if __name__ == "__main__":
    key = jax.random.PRNGKey(0)
    k_w, k_x, k_t = jax.random.split(key, 3)

    # Case 1: the module's typical call (NCHW, temb ignored).
    B, C, H, W = 2, 4, 16, 16
    x = jax.random.normal(k_x, (B, C, H, W), dtype=jnp.float32)
    temb = jax.random.normal(k_t, (B, 32), dtype=jnp.float32)  # unused
    weight, bias = downsample_init(k_w, C)
    # Round inputs to bf16-representable values so the kernel's internal bf16
    # cast is lossless and the f32 reference can be matched tightly.
    x = x.astype(jnp.bfloat16).astype(jnp.float32)
    weight = weight.astype(jnp.bfloat16).astype(jnp.float32)

    y = jax.block_until_ready(downsample_forward(x, weight, bias, temb))
    y_ref = _reference_conv(x, weight, bias)
    assert y.shape == (B, C, H // 2, W // 2), y.shape
    err = float(jnp.max(jnp.abs(y - y_ref)))
    assert jnp.allclose(y, y_ref, atol=1e-4, rtol=1e-4), err

    # Case 2: forced row tiling (exercises the halo'd multi-tile path).
    x_nhwc = jnp.transpose(x, (0, 2, 3, 1))
    y2 = jax.block_until_ready(
        downsample_forward_nhwc(x_nhwc, weight, bias, row_tiles=2))
    y2_ref = jnp.transpose(y_ref, (0, 2, 3, 1))
    err2 = float(jnp.max(jnp.abs(y2 - y2_ref)))
    assert jnp.allclose(y2, y2_ref, atol=1e-4, rtol=1e-4), err2

    # Case 3: odd spatial size + channel count not a lane multiple.
    B3, C3, H3, W3 = 1, 3, 15, 15
    k_w2, k_x2 = jax.random.split(k_w)
    x3 = jax.random.normal(k_x2, (B3, C3, H3, W3), dtype=jnp.float32)
    x3 = x3.astype(jnp.bfloat16).astype(jnp.float32)
    w3, b3 = downsample_init(k_w2, C3)
    w3 = w3.astype(jnp.bfloat16).astype(jnp.float32)
    y3 = jax.block_until_ready(downsample_forward(x3, w3, b3, None))
    y3_ref = _reference_conv(x3, w3, b3)
    assert y3.shape == (B3, C3, 8, 8), y3.shape
    err3 = float(jnp.max(jnp.abs(y3 - y3_ref)))
    assert jnp.allclose(y3, y3_ref, atol=1e-4, rtol=1e-4), err3

    print("KERNEL_OK")
</pallas_src>

<mosaic_0001>
module attributes {stable_mosaic.version = 11 : i64} {
  func.func @_downsample_kernel(%arg0: i32, %arg1: i32, %arg2: memref<1x9x9x8xbf16, #tpu.memory_space<vmem>>, %arg3: memref<1x8x9x8xbf16, #tpu.memory_space<vmem>>, %arg4: memref<6x8x128xbf16, #tpu.memory_space<vmem>>, %arg5: memref<1x128xf32, #tpu.memory_space<vmem>>, %arg6: memref<1x64x128xf32, #tpu.memory_space<vmem>>) attributes {dimension_semantics = [#tpu.dimension_semantics<parallel>, #tpu.dimension_semantics<parallel>], iteration_bounds = array<i64: 2, 1>, scalar_prefetch = 0 : i64, scratch_operands = 0 : i64, tpu.core_type = #tpu.core_type<tc>, window_params = [{transform_indices = @transform_0, window_bounds = array<i64: 1, 9, 9, 8>}, {transform_indices = @transform_1, window_bounds = array<i64: 1, 8, 9, 8>}, {pipeline_mode = #tpu.pipeline_mode<synchronous>, transform_indices = @transform_2, window_bounds = array<i64: 6, 8, 128>}, {pipeline_mode = #tpu.pipeline_mode<synchronous>, transform_indices = @transform_3, window_bounds = array<i64: 1, 128>}, {transform_indices = @transform_4, window_bounds = array<i64: 1, 64, 128>}]} {
    %c0 = arith.constant 0 : index
    %c0_0 = arith.constant 0 : index
    %0 = vector.load %arg5[%c0, %c0_0] : memref<1x128xf32, #tpu.memory_space<vmem>>, vector<1x128xf32>
    %c0_1 = arith.constant 0 : index
    %c0_2 = arith.constant 0 : index
    %c0_3 = arith.constant 0 : index
    %c0_4 = arith.constant 0 : index
    %1 = vector.load %arg2[%c0_1, %c0_2, %c0_3, %c0_4] : memref<1x9x9x8xbf16, #tpu.memory_space<vmem>>, vector<1x8x8x8xbf16>
    %2 = vector.shape_cast %1 : vector<1x8x8x8xbf16> to vector<8x8x8xbf16>
    %3 = vector.shape_cast %2 : vector<8x8x8xbf16> to vector<64x8xbf16>
    %c0_5 = arith.constant 0 : index
    %c0_6 = arith.constant 0 : index
    %c0_7 = arith.constant 0 : index
    %4 = vector.load %arg4[%c0_5, %c0_6, %c0_7] : memref<6x8x128xbf16, #tpu.memory_space<vmem>>, vector<1x8x128xbf16>
    %5 = vector.shape_cast %4 : vector<1x8x128xbf16> to vector<8x128xbf16>
    %cst = arith.constant dense<0.000000e+00> : vector<64x128xf32>
    %6 = tpu.matmul %3, %5, %cst {dimension_numbers = #tpu.dot_dimension_numbers<[1], [0], [0], [1], [0, 0, 1, 1], [], []>} : vector<64x8xbf16>, vector<8x128xbf16>, vector<64x128xf32> -> vector<64x128xf32>
    %7 = vector.broadcast %0 : vector<1x128xf32> to vector<64x128xf32>
    %8 = arith.addf %7, %6 : vector<64x128xf32>
    %c0_8 = arith.constant 0 : index
    %c0_9 = arith.constant 0 : index
    %c1 = arith.constant 1 : index
    %c0_10 = arith.constant 0 : index
    %9 = vector.load %arg2[%c0_8, %c0_9, %c1, %c0_10] : memref<1x9x9x8xbf16, #tpu.memory_space<vmem>>, vector<1x8x8x8xbf16>
    %10 = vector.shape_cast %9 : vector<1x8x8x8xbf16> to vector<8x8x8xbf16>
    %11 = vector.shape_cast %10 : vector<8x8x8xbf16> to vector<64x8xbf16>
    %c1_11 = arith.constant 1 : index
    %c0_12 = arith.constant 0 : index
    %c0_13 = arith.constant 0 : index
    %12 = vector.load %arg4[%c1_11, %c0_12, %c0_13] : memref<6x8x128xbf16, #tpu.memory_space<vmem>>, vector<1x8x128xbf16>
    %13 = vector.shape_cast %12 : vector<1x8x128xbf16> to vector<8x128xbf16>
    %cst_14 = arith.constant dense<0.000000e+00> : vector<64x128xf32>
    %14 = tpu.matmul %11, %13, %cst_14 {dimension_numbers = #tpu.dot_dimension_numbers<[1], [0], [0], [1], [0, 0, 1, 1], [], []>} : vector<64x8xbf16>, vector<8x128xbf16>, vector<64x128xf32> -> vector<64x128xf32>
    %15 = arith.addf %8, %14 : vector<64x128xf32>
    %c0_15 = arith.constant 0 : index
    %c0_16 = arith.constant 0 : index
    %c0_17 = arith.constant 0 : index
    %c0_18 = arith.constant 0 : index
    %16 = vector.load %arg3[%c0_15, %c0_16, %c0_17, %c0_18] : memref<1x8x9x8xbf16, #tpu.memory_space<vmem>>, vector<1x8x8x8xbf16>
    %17 = vector.shape_cast %16 : vector<1x8x8x8xbf16> to vector<8x8x8xbf16>
    %18 = vector.shape_cast %17 : vector<8x8x8xbf16> to vector<64x8xbf16>
    %c2 = arith.constant 2 : index
    %c0_19 = arith.constant 0 : index
    %c0_20 = arith.constant 0 : index
    %19 = vector.load %arg4[%c2, %c0_19, %c0_20] : memref<6x8x128xbf16, #tpu.memory_space<vmem>>, vector<1x8x128xbf16>
    %20 = vector.shape_cast %19 : vector<1x8x128xbf16> to vector<8x128xbf16>
    %cst_21 = arith.constant dense<0.000000e+00> : vector<64x128xf32>
    %21 = tpu.matmul %18, %20, %cst_21 {dimension_numbers = #tpu.dot_dimension_numbers<[1], [0], [0], [1], [0, 0, 1, 1], [], []>} : vector<64x8xbf16>, vector<8x128xbf16>, vector<64x128xf32> -> vector<64x128xf32>
    %22 = arith.addf %15, %21 : vector<64x128xf32>
    %c0_22 = arith.constant 0 : index
    %c0_23 = arith.constant 0 : index
    %c1_24 = arith.constant 1 : index
    %c0_25 = arith.constant 0 : index
    %23 = vector.load %arg3[%c0_22, %c0_23, %c1_24, %c0_25] : memref<1x8x9x8xbf16, #tpu.memory_space<vmem>>, vector<1x8x8x8xbf16>
    %24 = vector.shape_cast %23 : vector<1x8x8x8xbf16> to vector<8x8x8xbf16>
    %25 = vector.shape_cast %24 : vector<8x8x8xbf16> to vector<64x8xbf16>
    %c3 = arith.constant 3 : index
    %c0_26 = arith.constant 0 : index
    %c0_27 = arith.constant 0 : index
    %26 = vector.load %arg4[%c3, %c0_26, %c0_27] : memref<6x8x128xbf16, #tpu.memory_space<vmem>>, vector<1x8x128xbf16>
    %27 = vector.shape_cast %26 : vector<1x8x128xbf16> to vector<8x128xbf16>
    %cst_28 = arith.constant dense<0.000000e+00> : vector<64x128xf32>
    %28 = tpu.matmul %25, %27, %cst_28 {dimension_numbers = #tpu.dot_dimension_numbers<[1], [0], [0], [1], [0, 0, 1, 1], [], []>} : vector<64x8xbf16>, vector<8x128xbf16>, vector<64x128xf32> -> vector<64x128xf32>
    %29 = arith.addf %22, %28 : vector<64x128xf32>
    %c0_29 = arith.constant 0 : index
    %c1_30 = arith.constant 1 : index
    %c0_31 = arith.constant 0 : index
    %c0_32 = arith.constant 0 : index
    %30 = vector.load %arg2[%c0_29, %c1_30, %c0_31, %c0_32] : memref<1x9x9x8xbf16, #tpu.memory_space<vmem>>, vector<1x8x8x8xbf16>
    %31 = vector.shape_cast %30 : vector<1x8x8x8xbf16> to vector<8x8x8xbf16>
    %32 = vector.shape_cast %31 : vector<8x8x8xbf16> to vector<64x8xbf16>
    %c4 = arith.constant 4 : index
    %c0_33 = arith.constant 0 : index
    %c0_34 = arith.constant 0 : index
    %33 = vector.load %arg4[%c4, %c0_33, %c0_34] : memref<6x8x128xbf16, #tpu.memory_space<vmem>>, vector<1x8x128xbf16>
    %34 = vector.shape_cast %33 : vector<1x8x128xbf16> to vector<8x128xbf16>
    %cst_35 = arith.constant dense<0.000000e+00> : vector<64x128xf32>
    %35 = tpu.matmul %32, %34, %cst_35 {dimension_numbers = #tpu.dot_dimension_numbers<[1], [0], [0], [1], [0, 0, 1, 1], [], []>} : vector<64x8xbf16>, vector<8x128xbf16>, vector<64x128xf32> -> vector<64x128xf32>
    %36 = arith.addf %29, %35 : vector<64x128xf32>
    %c0_36 = arith.constant 0 : index
    %c1_37 = arith.constant 1 : index
    %c1_38 = arith.constant 1 : index
    %c0_39 = arith.constant 0 : index
    %37 = vector.load %arg2[%c0_36, %c1_37, %c1_38, %c0_39] : memref<1x9x9x8xbf16, #tpu.memory_space<vmem>>, vector<1x8x8x8xbf16>
    %38 = vector.shape_cast %37 : vector<1x8x8x8xbf16> to vector<8x8x8xbf16>
    %39 = vector.shape_cast %38 : vector<8x8x8xbf16> to vector<64x8xbf16>
    %c5 = arith.constant 5 : index
    %c0_40 = arith.constant 0 : index
    %c0_41 = arith.constant 0 : index
    %40 = vector.load %arg4[%c5, %c0_40, %c0_41] : memref<6x8x128xbf16, #tpu.memory_space<vmem>>, vector<1x8x128xbf16>
    %41 = vector.shape_cast %40 : vector<1x8x128xbf16> to vector<8x128xbf16>
    %cst_42 = arith.constant dense<0.000000e+00> : vector<64x128xf32>
    %42 = tpu.matmul %39, %41, %cst_42 {dimension_numbers = #tpu.dot_dimension_numbers<[1], [0], [0], [1], [0, 0, 1, 1], [], []>} : vector<64x8xbf16>, vector<8x128xbf16>, vector<64x128xf32> -> vector<64x128xf32>
    %43 = arith.addf %36, %42 : vector<64x128xf32>
    %c0_43 = arith.constant 0 : index
    %c0_44 = arith.constant 0 : index
    %c0_45 = arith.constant 0 : index
    %44 = vector.load %arg6[%c0_43, %c0_44, %c0_45] : memref<1x64x128xf32, #tpu.memory_space<vmem>>, vector<1x64x128xf32>
    %45 = vector.shape_cast %44 : vector<1x64x128xf32> to vector<64x128xf32>
    %46 = vector.shape_cast %43 : vector<64x128xf32> to vector<1x64x128xf32>
    tpu.vector_store %arg6[%c0_43, %c0_44, %c0_45], %46 {strides = array<i32>} : memref<1x64x128xf32, #tpu.memory_space<vmem>>, vector<1x64x128xf32>,
    return
  }
  func.func @transform_0(%arg0: i32, %arg1: i32) -> (i32, i32, i32, i32) {
    %c1_i32 = arith.constant 1 : i32
    %0 = arith.muli %arg0, %c1_i32 : i32
    %1 = arith.addi %0, %arg1 : i32
    %c0_i32 = arith.constant 0 : i32
    %c0_i32_0 = arith.constant 0 : i32
    %c0_i32_1 = arith.constant 0 : i32
    %c0_i32_2 = arith.constant 0 : i32
    return %1, %c0_i32, %c0_i32_0, %c0_i32_1 : i32, i32, i32, i32
  }
  func.func @transform_1(%arg0: i32, %arg1: i32) -> (i32, i32, i32, i32) {
    %c1_i32 = arith.constant 1 : i32
    %0 = arith.muli %arg0, %c1_i32 : i32
    %1 = arith.addi %0, %arg1 : i32
    %c0_i32 = arith.constant 0 : i32
    %c0_i32_0 = arith.constant 0 : i32
    %c0_i32_1 = arith.constant 0 : i32
    %c0_i32_2 = arith.constant 0 : i32
    return %1, %c0_i32, %c0_i32_0, %c0_i32_1 : i32, i32, i32, i32
  }
  func.func @transform_2(%arg0: i32, %arg1: i32) -> (i32, i32, i32) {
    %c0_i32 = arith.constant 0 : i32
    %c0_i32_0 = arith.constant 0 : i32
    %c0_i32_1 = arith.constant 0 : i32
    %c0_i32_2 = arith.constant 0 : i32
    return %c0_i32, %c0_i32_0, %c0_i32_1 : i32, i32, i32
  }
  func.func @transform_3(%arg0: i32, %arg1: i32) -> (i32, i32) {
    %c0_i32 = arith.constant 0 : i32
    %c0_i32_0 = arith.constant 0 : i32
    %c0_i32_1 = arith.constant 0 : i32
    return %c0_i32, %c0_i32_0 : i32, i32
  }
  func.func @transform_4(%arg0: i32, %arg1: i32) -> (i32, i32, i32) {
    %c0_i32 = arith.constant 0 : i32
    %c0_i32_0 = arith.constant 0 : i32
    return %arg0, %arg1, %c0_i32 : i32, i32, i32
  }
}

</mosaic_0001>

<bundles_post_ra>
// kernel: downsample_forward.1
= control target key start
LH: loop header
LB: loop body
LE: loop exit
PB: predicated region body
PF: predicated region fallthrough
CT: control target
= control target key end

     0   :  { %s1687_s15 = smov 0   ;;  %s1689_s16 = smov 0   ;;  %s1932_s0 = inlined_call_operand.vmem [shape: bf16[2,9,9,8], index: 0, kind: input, shape index: {}]   ;;  %s1933_s1 = inlined_call_operand.vmem [shape: bf16[2,8,9,8], index: 1, kind: input, shape index: {}]   ;;  %s1934_s2 = inlined_call_operand.vmem [shape: bf16[6,8,128], index: 2, kind: input, shape index: {}]   ;;  %s1935_s3 = inlined_call_operand.vmem [shape: f32[1,128], index: 3, kind: input, shape index: {}]   ;;  %s1936_s4 = inlined_call_operand.vmem [shape: f32[2,64,128], index: 4, kind: output, shape index: {}]  }
   0x1   :  { %s1691_s17 = smov 0  }
   0x2 LB: > { %s26_s18 = sadd.s32 1, %s1656_s16  ;;  %p1417_p0 = scmp.ge.s32.totalorder %s1660_s17, 1  ;;  %s1660_s17 = sphi %s1691_s17, %s14_s17   ;;  %s1656_s16 = sphi %s1689_s16, %s1940_s16   ;;  %s1652_s15 = sphi %s1687_s15, %s1939_s15  }
   0x3   : > { %p28_p1 = scmp.ge.s32.totalorder %s26_s18, 2  ;;  %p194_p2 = scmp.lt.s32.totalorder %s1660_s17, 3 }
   0x5   : > { %s1942_s18 = smov (%p28_p1, %s26_s18), 0  ;;  %p195_p3 = pnand %p1417_p0, %p194_p2 }
   0x6   : > { %p232_p4 = scmp.lt.s32.totalorder (!%p195_p3), %s1652_s15, 1 }
   0x7   : > { %198 = sbr.rel (%p195_p3) target bundleno = 285 (0x11d), region = 36 }
   0xc   : > { %v265_v0 = vld [vmem:[%s1934_s2] sm:$0xf]  ;;  %vm299_vm0 = vcmask 1043456   ;;  %v1432_v2 = vld [vmem:[%s1934_s2 + $0x4] sm:$0xf]  ;;  %s1944_s15 = smov (!%p232_p4, %s1652_s15), 1 }
   0xd   : > { %1595 = vmatprep.subr.msk.bf16.mxu0 %vm299_vm0, %v265_v0  ;;  %v301_v1 = vsel %vm299_vm0, %v265_v0, 0  ;;  %v1441_v3 = vld [vmem:[%s1934_s2 + $0x8] sm:$0xf]  ;;  %1596 = vmatprep.subr.msk.bf16.mxu1 %vm299_vm0, %v1432_v2  ;;  %v540_v4 = vsel %vm299_vm0, %v1432_v2, 0  ;;  %v1450_v5 = vld [vmem:[%s1934_s2 + $0xc] sm:$0xf] }
   0xe   : > { %1536 = vmatpush3.bf16.msra.mxu0 %v301_v1  ;;  %1546 = vmatpush3.bf16.msra.mxu1 %v540_v4  ;;  %s1601_s27 = smul.u32 72, %s1944_s15  ;;  %s1503_s28 = sshll.u32 %s1944_s15, 6  ;;  %vm286_vm1 = vcmask 64512   ;;  %v658_v6 = vsel %vm299_vm0, %v1441_v3, 0  ;;  %vm398_vm2 = vsmask.f32 3328 }
   0xf   : > { %1597 = vmatprep.subr.msk.bf16.mxu0 %vm299_vm0, %v1441_v3  ;;  %1598 = vmatprep.subr.msk.bf16.mxu1 %vm299_vm0, %v1450_v5  ;;  %s1733_s5 = scalar_lea.vmem %s1933_s1, %s1503_s28  ;;  %vm399_vm3 = vsmask.f32 7440  ;;  %v1467_v7 = vld [vmem:[%s1934_s2 + $0x10] sm:$0xf]  ;;  %v1749_v11 = vsel %vm299_vm0, %v1450_v5, 0  ;;  %s1911_s21 = scalar_lea.vmem %s1936_s4, %s1503_s28 }
  0x10   : > { %s1738_s8 = scalar_lea.vmem %s1932_s0, %s1601_s27  ;;  %v1752_v12 = vsel %vm299_vm0, %v1467_v7, 0  ;;  %v1630_v26 = vld [vmem:[%s1733_s5] ss:$8 sps:$4 sm:$0xff]   ;;  %vm1769_vm4 = vmor %vm398_vm2, %vm399_vm3  ;;  %v1631_v5 = vld [vmem:[%s1733_s5 + $0x10] ss:$8 sps:$4 sm:$0xff]  }
  0x11   : > { %v1626_v8 = vld [vmem:[%s1738_s8] ss:$8 sps:$4 sm:$0xff]   ;;  %v1627_v9 = vld [vmem:[%s1738_s8 + $0x10] ss:$8 sps:$4 sm:$0xff]   ;;  %v383_v14 = vld [vmem:[%s1738_s8 + $0x4] sm:$0x1] }
  0x12   : > { %1537 = vmatprep.mubr.msk.bf16.mxu0 %vm286_vm1, %v1626_v8  ;;  %v1628_v10 = vld [vmem:[%s1738_s8 + $0x20] ss:$8 sps:$4 sm:$0xff]   ;;  %v1629_v16 = vld [vmem:[%s1738_s8 + $0x30] ss:$8 sps:$4 sm:$0xff]   ;;  %v385_v17 = vld [vmem:[%s1738_s8 + $0xc] sm:$0x1] }
  0x13   : > { %1538 = vmatmul.mubr.msk.bf16.vlgmr.msra.gmra.mxu0 %vm286_vm1, %v1627_v9  ;;  %v382_v13 = vld [vmem:[%s1738_s8] sm:$0xf]  ;;  %v384_v15 = vld [vmem:[%s1738_s8 + $0x8] sm:$0xf]  ;;  %v411_v20 = vshll.u32 %v383_v14, 16  ;;  %v425_v23 = vshll.u32 %v385_v17, 16 }
  0x14   : > { %1541 = vmatprep.mubr.msk.bf16.mxu0 %vm286_vm1, %v1628_v10  ;;  %1556 = vmatpush3.bf16.msra.mxu0 %v658_v6  ;;  %v402_v18 = vshrl.u32 %v382_v13, 16  ;;  %v405_v19 = vshll.u32 %v382_v13, 16  ;;  %v416_v21 = vshrl.u32 %v384_v15, 16  ;;  %v419_v22 = vshll.u32 %v384_v15, 16  ;;  %v386_v24 = vld [vmem:[%s1738_s8 + $0x10] sm:$0xf] }
  0x15   : > { %1599 = vmatprep.subr.msk.bf16.mxu0 %vm299_vm0, %v1467_v7  ;;  %v387_v25 = vld [vmem:[%s1738_s8 + $0x14] sm:$0x1]  ;;  %v413_v29 = vrot.slane %v411_v20, 5  ;;  %v388_v31 = vld [vmem:[%s1738_s8 + $0x18] sm:$0xf]  ;;  %v427_v33 = vrot.slane %v425_v23, 5 }
  0x16   : > { %v404_v27 = vrot.slane %v402_v18, 4  ;;  %v407_v28 = vrot.slane %v405_v19, 5  ;;  %v418_v30 = vrot.slane %v416_v21, 4  ;;  %v421_v32 = vrot.slane %v419_v22, 5  ;;  %v389_v34 = vld [vmem:[%s1738_s8 + $0x1c] sm:$0x1] }
  0x17   : > { %v430_v35 = vshrl.u32 %v386_v24, 16  ;;  %v433_v36 = vshll.u32 %v386_v24, 16  ;;  %v439_v38 = vshll.u32 %v387_v25, 16  ;;  %v444_v39 = vshrl.u32 %v388_v31, 16  ;;  %v390_v41 = vld [vmem:[%s1738_s8 + $0x20] sm:$0xf] }
  0x18   : > { %v408_v37 = vor.u32 %v407_v28, %v404_v27  ;;  %v447_v40 = vshll.u32 %v388_v31, 16  ;;  %v422_v43 = vor.u32 %v421_v32, %v418_v30  ;;  %v453_v46 = vshll.u32 %v389_v34, 16  ;;  %v391_v47 = vld [vmem:[%s1738_s8 + $0x24] sm:$0x1]  ;;  %v392_v52 = vld [vmem:[%s1738_s8 + $0x28] sm:$0xf] }
  0x19   : > { %v432_v44 = vrot.slane %v430_v35, 4  ;;  %v435_v45 = vrot.slane %v433_v36, 5  ;;  %v441_v49 = vrot.slane %v439_v38, 5  ;;  %v446_v50 = vrot.slane %v444_v39, 4  ;;  %v393_v56 = vld [vmem:[%s1738_s8 + $0x2c] sm:$0x1] }
  0x1a   : > { %v409_v48 = vrot.slane %v408_v37, 4  ;;  %v449_v51 = vrot.slane %v447_v40, 5  ;;  %v423_v53 = vrot.slane %v422_v43, 4  ;;  %v455_v55 = vrot.slane %v453_v46, 5  ;;  %v394_v6 = vld [vmem:[%s1738_s8 + $0x30] sm:$0xf] }
  0x1b   : > { %1542 = vmatmul.mubr.msk.bf16.gmra.mxu0 %vm286_vm1, %v1629_v16  ;;  %v436_v54 = vor.u32 %v435_v45, %v432_v44  ;;  %v458_v57 = vshrl.u32 %v390_v41, 16  ;;  %v461_v60 = vshll.u32 %v390_v41, 16  ;;  %v467_v61 = vshll.u32 %v391_v47, 16  ;;  %v395_v13 = vld [vmem:[%s1738_s8 + $0x34] sm:$0x1] }
  0x1c   : > { %1557 = vmatprep.mubr.msk.bf16.mxu0 %vm286_vm1, %v1630_v26  ;;  %v414_v58 = vsel %vm1769_vm4, %v409_v48, %v413_v29  ;;  %v450_v59 = vor.u32 %v449_v51, %v446_v50  ;;  %v428_v62 = vsel %vm1769_vm4, %v423_v53, %v427_v33  ;;  %v472_v1 = vshrl.u32 %v392_v52, 16  ;;  %v396_v16 = vld [vmem:[%s1738_s8 + $0x38] sm:$0xf]  ;;  %v397_v17 = vld [vmem:[%s1738_s8 + $0x3c] sm:$0x1] }
  0x1d   : > { %v437_v63 = vrot.slane %v436_v54, 4  ;;  %v460_v0 = vrot.slane %v458_v57, 4  ;;  %v1433_v2 = vcombine.low %v414_v58, %v428_v62  ;;  %v463_v4 = vrot.slane %v461_v60, 5  ;;  %v1795_v20 = vld [vmem:[%s1934_s2 + $0x14] sm:$0xf] }
  0x1e   : > { %v451_v3 = vrot.slane %v450_v59, 4  ;;  %v474_v8 = vrot.slane %v472_v1, 4  ;;  %v475_v9 = vshll.u32 %v392_v52, 16  ;;  %v481_v10 = vshll.u32 %v393_v56, 16  ;;  %v1632_v33 = vld [vmem:[%s1733_s5 + $0x20] ss:$8 sps:$4 sm:$0xff]  }
  0x1f   : > { %v442_v7 = vsel %vm1769_vm4, %v437_v63, %v441_v49  ;;  %1547 = vmatprep.mubr.msk.bf16.mxu1 %vm286_vm1, %v1433_v2  ;;  %v464_v15 = vor.u32 %v463_v4, %v460_v0  ;;  %v486_v18 = vshrl.u32 %v394_v6, 16  ;;  %v489_v19 = vshll.u32 %v394_v6, 16  ;;  %v1633_v40 = vld [vmem:[%s1733_s5 + $0x30] ss:$8 sps:$4 sm:$0xff]   ;;  %v733_v41 = vld [vmem:[%s1733_s5] sm:$0xf] }
  0x20   : > { %v456_v14 = vsel %vm1769_vm4, %v451_v3, %v455_v55  ;;  %v469_v22 = vrot.slane %v467_v61, 5  ;;  %v477_v23 = vrot.slane %v475_v9, 5  ;;  %v495_v24 = vshll.u32 %v395_v13, 16  ;;  %v734_v43 = vld [vmem:[%s1733_s5 + $0x4] sm:$0x1] }
  0x21   : > { %v1434_v21 = vcombine.low %v442_v7, %v456_v14  ;;  %v465_v25 = vrot.slane %v464_v15, 4  ;;  %v488_v26 = vrot.slane %v486_v18, 4  ;;  %v491_v27 = vrot.slane %v489_v19, 5  ;;  %v735_v46 = vld [vmem:[%s1733_s5 + $0x8] sm:$0xf] }
  0x22   : > { %v500_v28 = vshrl.u32 %v396_v16, 16  ;;  %v478_v29 = vor.u32 %v477_v23, %v474_v8  ;;  %v483_v30 = vrot.slane %v481_v10, 5  ;;  %v503_v31 = vshll.u32 %v396_v16, 16  ;;  %v736_v47 = vld [vmem:[%s1733_s5 + $0xc] sm:$0x1] }
  0x23   : > { %1558 = vmatmul.mubr.msk.bf16.vlgmr.msra.gmra.mxu0 %vm286_vm1, %v1631_v5  ;;  %1548 = vmatmul.mubr.msk.bf16.vlgmr.msra.gmra.mxu1 %vm286_vm1, %v1434_v21  ;;  %v509_v32 = vshll.u32 %v397_v17, 16  ;;  %v492_v34 = vor.u32 %v491_v27, %v488_v26  ;;  %v497_v35 = vrot.slane %v495_v24, 5  ;;  %v470_v37 = vsel %vm1769_vm4, %v465_v25, %v469_v22  ;;  %v737_v54 = vld [vmem:[%s1733_s5 + $0x10] sm:$0xf]  ;;  %v738_v55 = vld [vmem:[%s1733_s5 + $0x14] sm:$0x1] }
  0x24   : > { %1576 = vmatpush3.bf16.msra.mxu0 %v1752_v12  ;;  %1566 = vmatpush3.bf16.msra.mxu1 %v1749_v11  ;;  %v502_v36 = vrot.slane %v500_v28, 4  ;;  %v479_v38 = vrot.slane %v478_v29, 4  ;;  %v505_v39 = vrot.slane %v503_v31, 5  ;;  %v750_v48 = vshrl.u32 %v733_v41, 16  ;;  %v739_v60 = vld [vmem:[%s1733_s5 + $0x18] sm:$0xf] }
  0x25   : > { %1561 = vmatprep.mubr.msk.bf16.mxu0 %vm286_vm1, %v1632_v33  ;;  %1600 = vmatprep.subr.msk.bf16.mxu1 %vm299_vm0, %v1795_v20  ;;  %v493_v12 = vrot.slane %v492_v34, 4  ;;  %v511_v11 = vrot.slane %v509_v32, 5  ;;  %v753_v49 = vshll.u32 %v733_v41, 16  ;;  %v759_v52 = vshll.u32 %v734_v43, 16  ;;  %v740_v0 = vld [vmem:[%s1733_s5 + $0x1c] sm:$0x1] }
  0x26   : > { %v484_v44 = vsel %vm1769_vm4, %v479_v38, %v483_v30  ;;  %v506_v45 = vor.u32 %v505_v39, %v502_v36  ;;  %v764_v53 = vshrl.u32 %v735_v46, 16  ;;  %v752_v57 = vrot.slane %v750_v48, 4  ;;  %v1634_v10 = vld [vmem:[%s1738_s8 + $0x8] ss:$8 sps:$4 sm:$0xff]   ;;  %v741_v17 = vld [vmem:[%s1733_s5 + $0x20] sm:$0xf] }
  0x27   : > { %v1435_v50 = vcombine.low %v470_v37, %v484_v44  ;;  %v498_v51 = vsel %vm1769_vm4, %v493_v12, %v497_v35  ;;  %v755_v58 = vrot.slane %v753_v49, 5  ;;  %v767_v59 = vshll.u32 %v735_v46, 16  ;;  %v742_v22 = vld [vmem:[%s1733_s5 + $0x24] sm:$0x1]  ;;  %v743_v28 = vld [vmem:[%s1733_s5 + $0x28] sm:$0xf] }
  0x28   : > { %v507_v56 = vrot.slane %v506_v45, 4  ;;  %v761_v61 = vrot.slane %v759_v52, 5  ;;  %v766_v62 = vrot.slane %v764_v53, 4  ;;  %v773_v63 = vshll.u32 %v736_v47, 16  ;;  %v744_v29 = vld [vmem:[%s1733_s5 + $0x2c] sm:$0x1] }
  0x29   : > { %1551 = vmatprep.mubr.msk.bf16.mxu1 %vm286_vm1, %v1435_v50  ;;  %v778_v1 = vshrl.u32 %v737_v54, 16  ;;  %v756_v3 = vor.u32 %v755_v58, %v752_v57  ;;  %v769_v4 = vrot.slane %v767_v59, 5  ;;  %v781_v5 = vshll.u32 %v737_v54, 16  ;;  %v745_v41 = vld [vmem:[%s1733_s5 + $0x30] sm:$0xf] }
  0x2a   : > { %v512_v2 = vsel %vm1769_vm4, %v507_v56, %v511_v11  ;;  %v775_v7 = vrot.slane %v773_v63, 5  ;;  %v787_v9 = vshll.u32 %v738_v55, 16  ;;  %v792_v16 = vshrl.u32 %v739_v60, 16  ;;  %v1635_v11 = vld [vmem:[%s1738_s8 + $0x18] ss:$8 sps:$4 sm:$0xff]  }
  0x2b   : > { %1562 = vmatmul.mubr.msk.bf16.gmra.mxu0 %vm286_vm1, %v1633_v40  ;;  %v1436_v6 = vcombine.low %v498_v51, %v512_v2  ;;  %v780_v8 = vrot.slane %v778_v1, 4  ;;  %v757_v13 = vrot.slane %v756_v3, 4  ;;  %v770_v14 = vor.u32 %v769_v4, %v766_v62  ;;  %v746_v46 = vld [vmem:[%s1733_s5 + $0x34] sm:$0x1]  ;;  %v747_v51 = vld [vmem:[%s1733_s5 + $0x38] sm:$0xf] }
  0x2c   : > { %v783_v15 = vrot.slane %v781_v5, 5  ;;  %v789_v18 = vrot.slane %v787_v9, 5  ;;  %v795_v19 = vshll.u32 %v739_v60, 16  ;;  %v801_v21 = vshll.u32 %v740_v0, 16  ;;  %1577 = vmatprep.mubr.msk.bf16.mxu0 %vm286_vm1, %v1634_v10  ;;  %v748_v52 = vld [vmem:[%s1733_s5 + $0x3c] sm:$0x1] }
  0x2d   : > { %1552 = vmatmul.mubr.msk.bf16.gmra.mxu1 %vm286_vm1, %v1436_v6  ;;  %v806_v23 = vshrl.u32 %v741_v17, 16  ;;  %v762_v24 = vsel %vm1769_vm4, %v757_v13, %v761_v61  ;;  %v771_v25 = vrot.slane %v770_v14, 4  ;;  %v794_v27 = vrot.slane %v792_v16, 4  ;;  %v1636_v61 = vld [vmem:[%s1738_s8 + $0x28] ss:$8 sps:$4 sm:$0xff]  }
  0x2e   : > { %v784_v26 = vor.u32 %v783_v15, %v780_v8  ;;  %v797_v30 = vrot.slane %v795_v19, 5  ;;  %v803_v31 = vrot.slane %v801_v21, 5  ;;  %v809_v33 = vshll.u32 %v741_v17, 16  ;;  %v1637_v9 = vld [vmem:[%s1738_s8 + $0x38] ss:$8 sps:$4 sm:$0xff]  }
  0x2f   : > { %v808_v32 = vrot.slane %v806_v23, 4  ;;  %v776_v34 = vsel %vm1769_vm4, %v771_v25, %v775_v7  ;;  %v815_v36 = vshll.u32 %v742_v22, 16  ;;  %v820_v37 = vshrl.u32 %v743_v28, 16  ;;  %v1477_v14 = vld [vmem:[%s1738_s8 + $0xc] sm:$0x1] }
  0x30   : > { %v785_v35 = vrot.slane %v784_v26, 4  ;;  %v1451_v38 = vcombine.low %v762_v24, %v776_v34  ;;  %v798_v39 = vor.u32 %v797_v30, %v794_v27  ;;  %v811_v40 = vrot.slane %v809_v33, 5  ;;  %v1478_v15 = vld [vmem:[%s1738_s8 + $0x10] sm:$0xf]  ;;  %v1479_v21 = vld [vmem:[%s1738_s8 + $0x14] sm:$0x1] }
  0x31   : > { %v823_v12 = vshll.u32 %v743_v28, 16  ;;  %v817_v43 = vrot.slane %v815_v36, 5  ;;  %v822_v44 = vrot.slane %v820_v37, 4  ;;  %v829_v45 = vshll.u32 %v744_v29, 16  ;;  %v1480_v27 = vld [vmem:[%s1738_s8 + $0x18] sm:$0xf] }
  0x32   : > { %1567 = vmatprep.mubr.msk.bf16.mxu1 %vm286_vm1, %v1451_v38  ;;  %v790_v47 = vsel %vm1769_vm4, %v785_v35, %v789_v18  ;;  %v799_v48 = vrot.slane %v798_v39, 4  ;;  %v812_v49 = vor.u32 %v811_v40, %v808_v32  ;;  %v834_v54 = vshrl.u32 %v745_v41, 16  ;;  %v1481_v32 = vld [vmem:[%s1738_s8 + $0x1c] sm:$0x1]  ;;  %v1482_v36 = vld [vmem:[%s1738_s8 + $0x20] sm:$0xf] }
  0x33   : > { %v825_v50 = vrot.slane %v823_v12, 5  ;;  %1578 = vmatmul.mubr.msk.bf16.vlgmr.msra.gmra.mxu0 %vm286_vm1, %v1635_v11  ;;  %v831_v53 = vrot.slane %v829_v45, 5  ;;  %v837_v55 = vshll.u32 %v745_v41, 16  ;;  %v843_v56 = vshll.u32 %v746_v46, 16  ;;  %v1483_v12 = vld [vmem:[%s1738_s8 + $0x24] sm:$0x1] }
  0x34   : > { %v804_v57 = vsel %vm1769_vm4, %v799_v48, %v803_v31  ;;  %v813_v58 = vrot.slane %v812_v49, 4  ;;  %v848_v60 = vshrl.u32 %v747_v51, 16  ;;  %v1237_v63 = vsel %vm299_vm0, %v1795_v20, 0  ;;  %1581 = vmatprep.mubr.msk.bf16.mxu0 %vm286_vm1, %v1636_v61  ;;  %v1476_v20 = vld [vmem:[%s1738_s8 + $0x8] sm:$0xf] }
  0x35   : > { %v826_v59 = vor.u32 %v825_v50, %v822_v44  ;;  %v1452_v62 = vcombine.low %v790_v47, %v804_v57  ;;  %v836_v0 = vrot.slane %v834_v54, 4  ;;  %v839_v1 = vrot.slane %v837_v55, 5  ;;  %v1484_v46 = vld [vmem:[%s1738_s8 + $0x28] sm:$0xf] }
  0x36   : > { %v818_v2 = vsel %vm1769_vm4, %v813_v58, %v817_v43  ;;  %v850_v4 = vrot.slane %v848_v60, 4  ;;  %v851_v5 = vshll.u32 %v747_v51, 16  ;;  %v845_v7 = vrot.slane %v843_v56, 5  ;;  %v1485_v51 = vld [vmem:[%s1738_s8 + $0x2c] sm:$0x1] }
  0x37   : > { %v827_v3 = vrot.slane %v826_v59, 4  ;;  %1568 = vmatmul.mubr.msk.bf16.vlgmr.msra.gmra.mxu1 %vm286_vm1, %v1452_v62  ;;  %v840_v6 = vor.u32 %v839_v1, %v836_v0  ;;  %v857_v8 = vshll.u32 %v748_v52, 16  ;;  %v1099_v16 = vshrl.u32 %v1476_v20, 16  ;;  %v1486_v56 = vld [vmem:[%s1738_s8 + $0x30] sm:$0xf] }
  0x38   : > { %1586 = vmatpush3.bf16.msra.mxu1 %v1237_v63  ;;  %v853_v13 = vrot.slane %v851_v5, 5  ;;  %v1102_v22 = vshll.u32 %v1476_v20, 16  ;;  %v1108_v25 = vshll.u32 %v1477_v14, 16  ;;  %v1113_v26 = vshrl.u32 %v1478_v15, 16  ;;  %v1487_v62 = vld [vmem:[%s1738_s8 + $0x34] sm:$0x1] }
  0x39   : > { %v832_v10 = vsel %vm1769_vm4, %v827_v3, %v831_v53  ;;  %v841_v18 = vrot.slane %v840_v6, 4  ;;  %v859_v19 = vrot.slane %v857_v8, 5  ;;  %v1101_v24 = vrot.slane %v1099_v16, 4  ;;  %v1488_v5 = vld [vmem:[%s1738_s8 + $0x38] sm:$0xf] }
  0x3a   : > { %v1453_v17 = vcombine.low %v818_v2, %v832_v10  ;;  %v854_v23 = vor.u32 %v853_v13, %v850_v4  ;;  %v1104_v29 = vrot.slane %v1102_v22, 5  ;;  %v1116_v30 = vshll.u32 %v1478_v15, 16  ;;  %v1489_v20 = vld [vmem:[%s1738_s8 + $0x3c] sm:$0x1]  ;;  %v1490_v10 = vld [vmem:[%s1738_s8 + $0x40] sm:$0xf] }
  0x3b   : > { %1582 = vmatmul.mubr.msk.bf16.gmra.mxu0 %vm286_vm1, %v1637_v9  ;;  %v846_v28 = vsel %vm1769_vm4, %v841_v18, %v845_v7  ;;  %v1122_v31 = vshll.u32 %v1479_v21, 16  ;;  %v1110_v34 = vrot.slane %v1108_v25, 5  ;;  %v1115_v35 = vrot.slane %v1113_v26, 4 }
  0x3c   : > { %1571 = vmatprep.mubr.msk.bf16.mxu1 %vm286_vm1, %v1453_v17  ;;  %v855_v33 = vrot.slane %v854_v23, 4  ;;  %v1127_v37 = vshrl.u32 %v1480_v27, 16  ;;  %v1105_v38 = vor.u32 %v1104_v29, %v1101_v24  ;;  %v1118_v39 = vrot.slane %v1116_v30, 5  ;;  %v1491_v24 = vld [vmem:[%s1738_s8 + $0x44] sm:$0x1] }
  0x3d   : > { %v1124_v40 = vrot.slane %v1122_v31, 5  ;;  %v1130_v11 = vshll.u32 %v1480_v27, 16  ;;  %v1136_v44 = vshll.u32 %v1481_v32, 16  ;;  %v1141_v45 = vshrl.u32 %v1482_v36, 16 }
  0x3e   : > { %v860_v41 = vsel %vm1769_vm4, %v855_v33, %v859_v19  ;;  %v1129_v43 = vrot.slane %v1127_v37, 4  ;;  %v1106_v48 = vrot.slane %v1105_v38, 4  ;;  %v1119_v49 = vor.u32 %v1118_v39, %v1115_v35 }
  0x3f   : > { %v1454_v47 = vcombine.low %v846_v28, %v860_v41  ;;  %v1132_v50 = vrot.slane %v1130_v11, 5  ;;  %v1138_v52 = vrot.slane %v1136_v44, 5  ;;  %v1143_v53 = vrot.slane %v1141_v45, 4 }
  0x40   : > { %v1144_v54 = vshll.u32 %v1482_v36, 16  ;;  %v1150_v55 = vshll.u32 %v1483_v12, 16  ;;  %v1111_v57 = vsel %vm1769_vm4, %v1106_v48, %v1110_v34  ;;  %v1120_v58 = vrot.slane %v1119_v49, 4 }
  0x41   : > { %1572 = vmatmul.mubr.msk.bf16.gmra.mxu1 %vm286_vm1, %v1454_v47  ;;  %v1133_v59 = vor.u32 %v1132_v50, %v1129_v43  ;;  %v1155_v60 = vshrl.u32 %v1484_v46, 16  ;;  %v1158_v63 = vshll.u32 %v1484_v46, 16  ;;  %v1164_v0 = vshll.u32 %v1485_v51, 16 }
  0x42   : > { %v1146_v61 = vrot.slane %v1144_v54, 5  ;;  %v1125_v1 = vsel %vm1769_vm4, %v1120_v58, %v1124_v40  ;;  %v1169_v4 = vshrl.u32 %v1486_v56, 16  ;;  %v1152_v8 = vrot.slane %v1150_v55, 5 }
  0x43   : > { %v1134_v2 = vrot.slane %v1133_v59, 4  ;;  %v1157_v3 = vrot.slane %v1155_v60, 4  ;;  %v1493_v6 = vcombine.low %v1111_v57, %v1125_v1  ;;  %v1160_v9 = vrot.slane %v1158_v63, 5 }
  0x44   : > { %v1147_v7 = vor.u32 %v1146_v61, %v1143_v53  ;;  %v1171_v14 = vrot.slane %v1169_v4, 4  ;;  %v1172_v15 = vshll.u32 %v1486_v56, 16  ;;  %v1178_v16 = vshll.u32 %v1487_v62, 16 }
  0x45   : > { %v1139_v13 = vsel %vm1769_vm4, %v1134_v2, %v1138_v52  ;;  %1587 = vmatprep.mubr.msk.bf16.mxu1 %vm286_vm1, %v1493_v6  ;;  %v1161_v18 = vor.u32 %v1160_v9, %v1157_v3  ;;  %v1183_v19 = vshrl.u32 %v1488_v5, 16  ;;  %v1186_v21 = vshll.u32 %v1488_v5, 16 }
  0x46   : > { %v1148_v17 = vrot.slane %v1147_v7, 4  ;;  %v1166_v22 = vrot.slane %v1164_v0, 5  ;;  %v1174_v23 = vrot.slane %v1172_v15, 5  ;;  %v1192_v25 = vshll.u32 %v1489_v20, 16 }
  0x47   : > { %v1197_v26 = vshrl.u32 %v1490_v10, 16  ;;  %v1162_v28 = vrot.slane %v1161_v18, 4  ;;  %v1185_v29 = vrot.slane %v1183_v19, 4  ;;  %v1188_v30 = vrot.slane %v1186_v21, 5 }
  0x48   : > { %v1153_v27 = vsel %vm1769_vm4, %v1148_v17, %v1152_v8  ;;  %v1175_v32 = vor.u32 %v1174_v23, %v1171_v14  ;;  %v1180_v33 = vrot.slane %v1178_v16, 5  ;;  %v1200_v36 = vshll.u32 %v1490_v10, 16  ;;  %v1431_v14 = vld [vmem:[%s1935_s3] ss:$0 sm:$0xff] }
  0x49   : > { %v1494_v31 = vcombine.low %v1139_v13, %v1153_v27  ;;  %v1189_v34 = vor.u32 %v1188_v30, %v1185_v29  ;;  %v1199_v35 = vrot.slane %v1197_v26, 4  ;;  %v1206_v37 = vshll.u32 %v1491_v24, 16 }
  0x4a   : > { %v1167_v38 = vsel %vm1769_vm4, %v1162_v28, %v1166_v22  ;;  %v1176_v39 = vrot.slane %v1175_v32, 4  ;;  %v1194_v12 = vrot.slane %v1192_v25, 5  ;;  %v1202_v11 = vrot.slane %v1200_v36, 5 }
  0x4b   : > { %1588 = vmatmul.mubr.msk.bf16.vlgmr.msra.gmra.mxu1 %vm286_vm1, %v1494_v31  ;;  %v1190_v40 = vrot.slane %v1189_v34, 4  ;;  %v1208_v45 = vrot.slane %v1206_v37, 5 }
  0x4c   : > { %v1181_v41 = vsel %vm1769_vm4, %v1176_v39, %v1180_v33  ;;  %v1203_v44 = vor.u32 %v1202_v11, %v1199_v35 }
  0x4d   : > { %v1495_v43 = vcombine.low %v1167_v38, %v1181_v41  ;;  %v1195_v46 = vsel %vm1769_vm4, %v1190_v40, %v1194_v12 }
  0x4e   : > { %v1204_v47 = vrot.slane %v1203_v44, 4 }
  0x4f   : > { %1591 = vmatprep.mubr.msk.bf16.mxu1 %vm286_vm1, %v1495_v43 }
  0x50   : > { %v1209_v48 = vsel %vm1769_vm4, %v1204_v47, %v1208_v45 }
  0x51   : > { %v1496_v49 = vcombine.low %v1195_v46, %v1209_v48 }
  0x53   : > { %1592 = vmatmul.mubr.msk.bf16.gmra.mxu1 %vm286_vm1, %v1496_v49 }
  0xd3   : > { %v1539_v50 = vpop.f32.mrf.mxu0 }
  0xd4   : > { %v376_v17 = vadd.f32 %v1539_v50, %v1431_v14 }
  0xd5   : > { %v337_v51 = vpop.f32.mrf.mxu0 }
  0xd6   : > { %v374_v22 = vadd.f32 %v1431_v14, %v337_v51 }
  0xd7   : > { %v1540_v52 = vpop.f32.mrf.mxu0 }
  0xd8   : > { %v377_v25 = vadd.f32 %v1540_v52, %v1431_v14 }
  0xd9   : > { %v340_v53 = vpop.f32.mrf.mxu0 }
  0xda   : > { %v375_v30 = vadd.f32 %v1431_v14, %v340_v53 }
  0xdb   : > { %v1543_v54 = vpop.f32.mrf.mxu0 }
  0xdc   : > { %v380_v34 = vadd.f32 %v1543_v54, %v1431_v14 }
  0xdd   : > { %v353_v55 = vpop.f32.mrf.mxu0 }
  0xde   : > { %v378_v44 = vadd.f32 %v1431_v14, %v353_v55 }
  0xdf   : > { %v1544_v56 = vpop.f32.mrf.mxu0 }
  0xe0   : > { %v381_v50 = vadd.f32 %v1544_v56, %v1431_v14 }
  0xe1   : > { %v1899_v57 = vpop.f32.mrf.mxu0 }
  0xe3   : > { %v1559_v58 = vpop.f32.mrf.mxu0  ;;  %v1549_v59 = vpop.f32.mrf.mxu1 }
  0xe4   : > { %v609_v23 = vadd.f32 %v1549_v59, %v376_v17 }
  0xe5   : > { %v694_v60 = vpop.f32.mrf.mxu0  ;;  %v576_v61 = vpop.f32.mrf.mxu1 }
  0xe6   : > { %v607_v26 = vadd.f32 %v576_v61, %v374_v22  ;;  %v727_v27 = vadd.f32 %v1559_v58, %v609_v23 }
  0xe7   : > { %v1560_v62 = vpop.f32.mrf.mxu0  ;;  %v1550_v63 = vpop.f32.mrf.mxu1 }
  0xe8   : > { %v610_v31 = vadd.f32 %v1550_v63, %v377_v25  ;;  %v725_v32 = vadd.f32 %v694_v60, %v607_v26  ;;  %v379_v60 = vadd.f32 %v1431_v14, %v1899_v57 }
  0xe9   : > { %v697_v42 = vpop.f32.mrf.mxu0  ;;  %v579_v0 = vpop.f32.mrf.mxu1 }
  0xea   : > { %v608_v35 = vadd.f32 %v579_v0, %v375_v30  ;;  %v728_v36 = vadd.f32 %v1560_v62, %v610_v31 }
  0xeb   : > { %v1563_v1 = vpop.f32.mrf.mxu0 }
  0xec   : > { %v726_v12 = vadd.f32 %v697_v42, %v608_v35 }
  0xed   : > { %v1553_v2 = vpop.f32.mrf.mxu1  ;;  %v710_v4 = vpop.f32.mrf.mxu0 }
  0xee   : > { %v613_v46 = vadd.f32 %v1553_v2, %v380_v34 }
  0xef   : > { %v592_v3 = vpop.f32.mrf.mxu1  ;;  %v1564_v7 = vpop.f32.mrf.mxu0 }
  0xf0   : > { %v611_v53 = vadd.f32 %v592_v3, %v378_v44  ;;  %v731_v54 = vadd.f32 %v1563_v1, %v613_v46 }
  0xf1   : > { %v1554_v5 = vpop.f32.mrf.mxu1  ;;  %v1901_v9 = vpop.f32.mrf.mxu0 }
  0xf2   : > { %v614_v55 = vadd.f32 %v1554_v5, %v381_v50  ;;  %v729_v62 = vadd.f32 %v710_v4, %v611_v53 }
  0xf3   : > { %v595_v6 = vpop.f32.mrf.mxu1  ;;  %v1579_v13 = vpop.f32.mrf.mxu0 }
  0xf4   : > { %v612_v2 = vadd.f32 %v595_v6, %v379_v60  ;;  %v732_v56 = vadd.f32 %v1564_v7, %v614_v55 }
  0xf5   : > { %v1043_v16 = vpop.f32.mrf.mxu0 }
  0xf7   : > { %v1569_v8 = vpop.f32.mrf.mxu1  ;;  %v1580_v21 = vpop.f32.mrf.mxu0 }
  0xf8   : > { %v957_v33 = vadd.f32 %v1569_v8, %v727_v27 }
  0xf9   : > { %v924_v20 = vpop.f32.mrf.mxu1  ;;  %v1046_v28 = vpop.f32.mrf.mxu0 }
  0xfa   : > { %v955_v37 = vadd.f32 %v924_v20, %v725_v32  ;;  %v1076_v38 = vadd.f32 %v1579_v13, %v957_v33  ;;  %v730_v20 = vadd.f32 %v1901_v9, %v612_v2 }
  0xfb   : > { %v1570_v10 = vpop.f32.mrf.mxu1  ;;  %v1583_v39 = vpop.f32.mrf.mxu0 }
  0xfc   : > { %v958_v11 = vadd.f32 %v1570_v10, %v728_v36  ;;  %v1074_v41 = vadd.f32 %v1043_v16, %v955_v37 }
  0xfd   : > { %v927_v15 = vpop.f32.mrf.mxu1  ;;  %v1059_v51 = vpop.f32.mrf.mxu0 }
  0xfe   : > { %v956_v47 = vadd.f32 %v927_v15, %v726_v12  ;;  %v1077_v48 = vadd.f32 %v1580_v21, %v958_v11 }
  0xff   : > { %v1584_v0 = vpop.f32.mrf.mxu0 }
 0x100   : > { %v1075_v58 = vadd.f32 %v1046_v28, %v956_v47 }
 0x101   : > { %v1573_v18 = vpop.f32.mrf.mxu1  ;;  %v1062_v4 = vpop.f32.mrf.mxu0 }
 0x102   : > { %v961_v63 = vadd.f32 %v1573_v18, %v731_v54 }
 0x103   : > { %v940_v19 = vpop.f32.mrf.mxu1 }
 0x104   : > { %v959_v8 = vadd.f32 %v940_v19, %v729_v62  ;;  %v1080_v3 = vadd.f32 %v1583_v39, %v961_v63 }
 0x105   : > { %v1574_v24 = vpop.f32.mrf.mxu1 }
 0x106   : > { %v962_v10 = vadd.f32 %v1574_v24, %v732_v56  ;;  %v1078_v57 = vadd.f32 %v1059_v51, %v959_v8 }
 0x107   : > { %v943_v29 = vpop.f32.mrf.mxu1 }
 0x108   : > { %v960_v14 = vadd.f32 %v943_v29, %v730_v20  ;;  %v1081_v15 = vadd.f32 %v1584_v0, %v962_v10 }
 0x10a   : > { %v1079_v7 = vadd.f32 %v1062_v4, %v960_v14 }
 0x10b   : > { %v1589_v40 = vpop.f32.mrf.mxu1 }
 0x10c   : > { %v1306_v43 = vadd.f32 %v1589_v40, %v1076_v38 }
 0x10d   : > { %v1273_v45 = vpop.f32.mrf.mxu1 }
 0x10e   : > { %1314 = vst [vmem:[%s1911_s21 + $0x10] sm:$0xff] %v1306_v43  ;;  %v1304_v49 = vadd.f32 %v1273_v45, %v1074_v41 }
 0x10f   : > { %v1590_v52 = vpop.f32.mrf.mxu1 }
 0x110   : > { %1312 = vst [vmem:[%s1911_s21] sm:$0xff] %v1304_v49  ;;  %v1307_v59 = vadd.f32 %v1590_v52, %v1077_v48 }
 0x111   : > { %v1276_v61 = vpop.f32.mrf.mxu1 }
 0x112   : > { %1315 = vst [vmem:[%s1911_s21 + $0x18] sm:$0xff] %v1307_v59  ;;  %v1305_v42 = vadd.f32 %v1276_v61, %v1075_v58 }
 0x113   : > { %v1593_v1 = vpop.f32.mrf.mxu1 }
 0x114   : > { %1313 = vst [vmem:[%s1911_s21 + $0x8] sm:$0xff] %v1305_v42  ;;  %v1310_v5 = vadd.f32 %v1593_v1, %v1080_v3 }
 0x115   : > { %v1289_v13 = vpop.f32.mrf.mxu1 }
 0x116   : > { %1318 = vst [vmem:[%s1911_s21 + $0x30] sm:$0xff] %v1310_v5  ;;  %v1308_v16 = vadd.f32 %v1289_v13, %v1078_v57 }
 0x117   : > { %v1594_v6 = vpop.f32.mrf.mxu1 }
 0x118   : > { %1316 = vst [vmem:[%s1911_s21 + $0x20] sm:$0xff] %v1308_v16  ;;  %v1311_v17 = vadd.f32 %v1594_v6, %v1081_v15 }
 0x119   : > { %v1292_v18 = vpop.f32.mrf.mxu1 }
 0x11a   : > { %1319 = vst [vmem:[%s1911_s21 + $0x38] sm:$0xff] %v1311_v17  ;;  %v1309_v19 = vadd.f32 %v1292_v18, %v1079_v7 }
 0x11c   : > { %1317 = vst [vmem:[%s1911_s21 + $0x28] sm:$0xff] %v1309_v19 }
 0x11d PF: > { %s14_s17 = sadd.s32 1, %s1660_s17   ;;  %s1939_s15 = smov %s1656_s16 }
 0x11e   : > { %p11_p5 = scmp.ge.s32.totalorder %s14_s17, 4   ;;  %s1940_s16 = smov %s1942_s18 }
 0x120   :  { %13 = sbr.rel (!%p11_p5) target bundleno = 2 (0x2), region = 75 }

</bundles_post_ra>
